<compile_context>
chip_gen: v5e
topology: v5e:2x2
jax: 0.10.0
libtpu: 0.0.40
codegen_flags: <defaults>
</compile_context>

<pallas_src>
import math
import functools

import jax
import jax.numpy as jnp
from jax.experimental import pallas as pl
from jax.experimental.pallas import tpu as pltpu


def _build_pe(d_model: int, max_len: int) -> jnp.ndarray:
    """Positional-encoding buffer, shape (max_len, 1, d_model), f32 (as in PyTorch)."""
    position = jnp.arange(max_len, dtype=jnp.float32)[:, None]              # (L, 1)
    div_term = jnp.exp(jnp.arange(0, d_model, 2, dtype=jnp.float32)
                       * (-math.log(10000.0) / d_model))                    # (D/2,)
    pe = jnp.zeros((max_len, d_model), dtype=jnp.float32)
    pe = pe.at[:, 0::2].set(jnp.sin(position * div_term))
    pe = pe.at[:, 1::2].set(jnp.cos(position * div_term))
    return pe[:, None, :]                                                   # (L, 1, D)


def _pe_add_kernel(x_ref, pe_ref, o_ref):
    # x: (tS, B, D)   pe: (tS, 1, D) -> broadcast over batch   o: (tS, B, D)
    o_ref[...] = (x_ref[...] + pe_ref[...]).astype(o_ref.dtype)


def _pe_add_dropout_kernel(x_ref, pe_ref, u_ref, o_ref, *, dropout_p):
    # Inverted dropout: keep with prob (1 - p), scale kept values by 1/(1-p).
    scale = 1.0 / (1.0 - dropout_p)                 # python float constant
    y = x_ref[...] + pe_ref[...]
    keep = u_ref[...] >= jnp.float32(dropout_p)
    o_ref[...] = jnp.where(keep, y * scale, 0.0).astype(o_ref.dtype)


def positional_encoding_forward(x, pe_table, *, dropout_p=0.1, training=False,
                                rng_key=None, seq_tile=None):
    """x: (seq_len, batch, d_model) f32.  pe_table: (max_len, 1, d_model) f32."""
    S, B, D = x.shape
    assert pe_table.ndim == 3 and pe_table.shape[1] == 1 and pe_table.shape[2] == D
    assert pe_table.shape[0] >= S

    # Tile the seq axis so each x tile is ~<=1 MiB: portable across v5e/v6e/v7x
    # VMEM budgets even with double-buffered in + out blocks.
    if seq_tile is None:
        row_bytes = B * D * x.dtype.itemsize
        seq_tile = max(1, min(S, (1 << 20) // max(1, row_bytes)))
    grid = (pl.cdiv(S, seq_tile),)

    x_spec = pl.BlockSpec((seq_tile, B, D), lambda i: (i, 0, 0))
    pe_spec = pl.BlockSpec((seq_tile, 1, D), lambda i: (i, 0, 0))
    out_spec = pl.BlockSpec((seq_tile, B, D), lambda i: (i, 0, 0))
    compiler_params = pltpu.CompilerParams(dimension_semantics=("parallel",))

    apply_dropout = training and dropout_p > 0.0
    if apply_dropout:
        if rng_key is None:
            rng_key = jax.random.PRNGKey(0)
        u = jax.random.uniform(rng_key, (S, B, D), dtype=jnp.float32)
        kernel = functools.partial(_pe_add_dropout_kernel, dropout_p=float(dropout_p))
        return pl.pallas_call(
            kernel,
            out_shape=jax.ShapeDtypeStruct((S, B, D), x.dtype),
            grid=grid,
            in_specs=[x_spec, pe_spec, x_spec],
            out_specs=out_spec,
            compiler_params=compiler_params,
        )(x, pe_table, u)

    return pl.pallas_call(
        _pe_add_kernel,
        out_shape=jax.ShapeDtypeStruct((S, B, D), x.dtype),
        grid=grid,
        in_specs=[x_spec, pe_spec],
        out_specs=out_spec,
        compiler_params=compiler_params,
    )(x, pe_table)


if __name__ == "__main__":
    d_model = 512            # MotionTransformer uses d_model = 512 (lane-dense)
    max_len = 64
    seq_len = 8
    batch = 2

    key = jax.random.PRNGKey(0)
    kx, kd = jax.random.split(key)
    x = jax.random.normal(kx, (seq_len, batch, d_model), dtype=jnp.float32)

    pe_table = _build_pe(d_model, max_len)
    ref = x + pe_table[:seq_len]                      # broadcast over batch

    # Eval mode (dropout == identity): must match x + pe[:S].
    out_eval = positional_encoding_forward(x, pe_table, dropout_p=0.1, training=False)
    out_eval = jax.block_until_ready(out_eval)
    assert out_eval.shape == (seq_len, batch, d_model)
    assert jnp.allclose(out_eval, ref, atol=1e-6), "eval-mode mismatch"

    # Training mode: every output element is either dropped (0) or kept & scaled.
    p = 0.1
    out_train = positional_encoding_forward(
        x, pe_table, dropout_p=p, training=True, rng_key=kd)
    out_train = jax.block_until_ready(out_train)
    assert out_train.shape == (seq_len, batch, d_model)
    dropped = out_train == 0.0
    kept_ok = jnp.isclose(out_train, ref / (1.0 - p), atol=1e-5, rtol=1e-5)
    assert bool(jnp.all(dropped | kept_ok)), "train-mode dropout mismatch"

    print("KERNEL_OK")
</pallas_src>

<mosaic_0001>
module attributes {stable_mosaic.version = 11 : i64} {
  func.func @_pe_add_kernel(%arg0: i32, %arg1: memref<8x2x512xf32, #tpu.memory_space<vmem>>, %arg2: memref<8x1x512xf32, #tpu.memory_space<vmem>>, %arg3: memref<8x2x512xf32, #tpu.memory_space<vmem>>) attributes {dimension_semantics = [#tpu.dimension_semantics<parallel>], iteration_bounds = array<i64: 1>, scalar_prefetch = 0 : i64, scratch_operands = 0 : i64, tpu.core_type = #tpu.core_type<tc>, window_params = [{transform_indices = @transform_0, window_bounds = array<i64: 8, 2, 512>}, {transform_indices = @transform_1, window_bounds = array<i64: 8, 1, 512>}, {transform_indices = @transform_2, window_bounds = array<i64: 8, 2, 512>}]} {
    %c0 = arith.constant 0 : index
    %c0_0 = arith.constant 0 : index
    %c0_1 = arith.constant 0 : index
    %0 = vector.load %arg1[%c0, %c0_0, %c0_1] : memref<8x2x512xf32, #tpu.memory_space<vmem>>, vector<8x2x512xf32>
    %c0_2 = arith.constant 0 : index
    %c0_3 = arith.constant 0 : index
    %c0_4 = arith.constant 0 : index
    %1 = vector.load %arg2[%c0_2, %c0_3, %c0_4] : memref<8x1x512xf32, #tpu.memory_space<vmem>>, vector<8x1x512xf32>
    %2 = vector.broadcast %1 : vector<8x1x512xf32> to vector<8x2x512xf32>
    %3 = arith.addf %0, %2 : vector<8x2x512xf32>
    %c0_5 = arith.constant 0 : index
    %c0_6 = arith.constant 0 : index
    %c0_7 = arith.constant 0 : index
    %4 = vector.load %arg3[%c0_5, %c0_6, %c0_7] : memref<8x2x512xf32, #tpu.memory_space<vmem>>, vector<8x2x512xf32>
    tpu.vector_store %arg3[%c0_5, %c0_6, %c0_7], %3 {strides = array<i32>} : memref<8x2x512xf32, #tpu.memory_space<vmem>>, vector<8x2x512xf32>,
    return
  }
  func.func @transform_0(%arg0: i32) -> (i32, i32, i32) {
    %c0_i32 = arith.constant 0 : i32
    %c0_i32_0 = arith.constant 0 : i32
    %c0_i32_1 = arith.constant 0 : i32
    return %arg0, %c0_i32, %c0_i32_0 : i32, i32, i32
  }
  func.func @transform_1(%arg0: i32) -> (i32, i32, i32) {
    %c0_i32 = arith.constant 0 : i32
    %c0_i32_0 = arith.constant 0 : i32
    %c0_i32_1 = arith.constant 0 : i32
    return %arg0, %c0_i32, %c0_i32_0 : i32, i32, i32
  }
  func.func @transform_2(%arg0: i32) -> (i32, i32, i32) {
    %c0_i32 = arith.constant 0 : i32
    %c0_i32_0 = arith.constant 0 : i32
    %c0_i32_1 = arith.constant 0 : i32
    return %arg0, %c0_i32, %c0_i32_0 : i32, i32, i32
  }
}

</mosaic_0001>

<bundles_post_ra>
// kernel: tpu_custom_call.1
= control target key start
LH: loop header
LB: loop body
LE: loop exit
PB: predicated region body
PF: predicated region fallthrough
CT: control target
= control target key end

     0   :  { %7 = vsyncpa [#allocation3], 0  ;;  %s341_s0 = inlined_call_operand.hbm [shape: f32[8,2,512], index: 0, kind: input, shape index: {}]   ;;  %s342_s1 = inlined_call_operand.hbm [shape: f32[64,1,512], index: 1, kind: input, shape index: {}]   ;;  %s343_s2 = inlined_call_operand.hbm [shape: f32[8,2,512], index: 2, kind: output, shape index: {}]  }
   0x1   :  { %8 = vsyncpa [#allocation6], 0 }
   0x2   :  { %9 = vsyncpa [#allocation4], 0  ;;  %s14_s11 = sshll.u32 %s341_s0, 4  ;;  %s280_s12 = smov [#allocation2]   ;;  %s15_s11 = int_to_ptr.hbm [resolvable:$true] %s14_s11 }
   0x3   :  { %s16_s13 = sshll.u32 %s280_s12, 4  ;;  %s27_s16 = sshll.u32 %s342_s1, 4  ;;  %s17_s13 = int_to_ptr.vmem [resolvable:$true] %s16_s13  ;;  %s28_s16 = int_to_ptr.hbm [resolvable:$true] %s27_s16 }
   0x4   :  { %s281_s17 = smov 128   ;;  %s282_s18 = smov 8  }
   0x5   :  { %22 = dma.hbm_to_vmem [thread:$0]  %s15_s11, 1024, %s17_s13, [#allocation3], %s281_s17, %s281_s17, %s282_s18  }
   0x6   :  { %s283_s19 = smov [#allocation5]   ;;  %s284_s21 = smov 64  }
   0x7   :  { %s29_s20 = sshll.u32 %s283_s19, 4  ;;  %s285_s0 = smov 4   ;;  %s30_s20 = int_to_ptr.vmem [resolvable:$true] %s29_s20 }
   0x8   :  { %35 = dma.hbm_to_vmem [thread:$0]  %s28_s16, 512, %s30_s20, [#allocation6], %s284_s21, %s284_s21, %s285_s0  }
   0x9   :  { %274 = dma.done.wait [#allocation3], 1024  }
   0xa   :  { %275 = vsyncadd [#allocation3], 4294966272 }
   0xb   :  { %276 = dma.done.wait [#allocation6], 512  }
   0xc   :  { %277 = vsyncadd [#allocation6], 4294966784  ;;  %v52_v0 = vld [vmem:[#allocation5] sm:$0xf]  ;;  %vm124_vm0 = vcmask 1041408   ;;  %vm126_vm1 = vcmask 1045508  }
   0xd   :  { %v68_v1 = vperm.slane %v52_v0, 0  ;;  %v69_v2 = vperm.slane %v52_v0, 1  ;;  %v70_v3 = vperm.slane %v52_v0, 2  ;;  %v71_v4 = vperm.slane %v52_v0, 3  ;;  %v53_v5 = vld [vmem:[#allocation5 + $0x4] sm:$0xf] }
   0xe   :  { %v72_v6 = vperm.slane %v53_v5, 0  ;;  %v73_v7 = vperm.slane %v53_v5, 1  ;;  %v74_v8 = vperm.slane %v53_v5, 2  ;;  %v75_v9 = vperm.slane %v53_v5, 3  ;;  %v54_v13 = vld [vmem:[#allocation5 + $0x8] sm:$0xf] }
   0xf   :  { %v100_v10 = vrot.slane %v69_v2, 6  ;;  %v101_v11 = vrot.slane %v70_v3, 4  ;;  %v102_v12 = vrot.slane %v71_v4, 2  ;;  %vm128_vm2 = vcmask 1043456   ;;  %v44_v14 = vld [vmem:[#allocation2] sm:$0xff]  ;;  %v45_v21 = vld [vmem:[#allocation2 + $0x8] sm:$0xff] }
  0x10   :  { %v103_v15 = vrot.slane %v73_v7, 6  ;;  %v104_v16 = vrot.slane %v74_v8, 4  ;;  %v105_v17 = vrot.slane %v75_v9, 2  ;;  %v76_v18 = vperm.slane %v54_v13, 0  ;;  %v55_v24 = vld [vmem:[#allocation5 + $0xc] sm:$0xf] }
  0x11   :  { %v125_v19 = vsel %vm124_vm0, %v68_v1, %v100_v10  ;;  %v127_v20 = vsel %vm126_vm1, %v101_v11, %v102_v12  ;;  %v77_v22 = vperm.slane %v54_v13, 1  ;;  %v78_v23 = vperm.slane %v54_v13, 2  ;;  %v56_v33 = vld [vmem:[#allocation5 + $0x10] sm:$0xf]  ;;  %v57_v47 = vld [vmem:[#allocation5 + $0x14] sm:$0xf] }
  0x12   :  { %v129_v25 = vsel %vm128_vm2, %v125_v19, %v127_v20  ;;  %v130_v26 = vsel %vm124_vm0, %v72_v6, %v103_v15  ;;  %v131_v27 = vsel %vm126_vm1, %v104_v16, %v105_v17  ;;  %v79_v28 = vperm.slane %v54_v13, 3  ;;  %v46_v38 = vld [vmem:[#allocation2 + $0x10] sm:$0xff]  ;;  %v47_v53 = vld [vmem:[#allocation2 + $0x18] sm:$0xff]  ;;  %v48_v63 = vld [vmem:[#allocation2 + $0x20] sm:$0xff]  ;;  %s286_s1 = smov [#allocation7]   ;;  %s181_s25 = sshll.u32 %s343_s2, 4  ;;  %s182_s25 = int_to_ptr.hbm [resolvable:$true] %s181_s25 }
  0x13   :  { %v159_v29 = vadd.f32 %v129_v25, %v44_v14  ;;  %v132_v30 = vsel %vm128_vm2, %v130_v26, %v131_v27  ;;  %v106_v31 = vrot.slane %v77_v22, 6  ;;  %v107_v32 = vrot.slane %v78_v23, 4  ;;  %v58_v61 = vld [vmem:[#allocation5 + $0x18] sm:$0xf]  ;;  %v59_v7 = vld [vmem:[#allocation5 + $0x1c] sm:$0xf] }
  0x14   :  { %v160_v34 = vadd.f32 %v132_v30, %v45_v21  ;;  %v108_v35 = vrot.slane %v79_v28, 2  ;;  %v80_v36 = vperm.slane %v55_v24, 0  ;;  %v81_v37 = vperm.slane %v55_v24, 1  ;;  %v49_v13 = vld [vmem:[#allocation2 + $0x28] sm:$0xff]  ;;  %v50_v26 = vld [vmem:[#allocation2 + $0x30] sm:$0xff]  ;;  %s179_s22 = sshll.u32 %s286_s1, 4  ;;  %s180_s22 = int_to_ptr.vmem [resolvable:$true] %s179_s22 }
  0x15   :  { %167 = vst [vmem:[#allocation7] sm:$0xff] %v159_v29  ;;  %v133_v39 = vsel %vm124_vm0, %v76_v18, %v106_v31  ;;  %v82_v40 = vperm.slane %v55_v24, 2  ;;  %v83_v41 = vperm.slane %v55_v24, 3  ;;  %v84_v42 = vperm.slane %v56_v33, 0 }
  0x16   :  { %168 = vst [vmem:[#allocation7 + $0x8] sm:$0xff] %v160_v34  ;;  %v134_v43 = vsel %vm126_vm1, %v107_v32, %v108_v35  ;;  %v109_v44 = vrot.slane %v81_v37, 6  ;;  %v85_v45 = vperm.slane %v56_v33, 1  ;;  %v86_v46 = vperm.slane %v56_v33, 2 }
  0x17   :  { %v135_v48 = vsel %vm128_vm2, %v133_v39, %v134_v43  ;;  %v110_v49 = vrot.slane %v82_v40, 4  ;;  %v111_v50 = vrot.slane %v83_v41, 2  ;;  %v87_v51 = vperm.slane %v56_v33, 3 }
  0x18   :  { %v161_v52 = vadd.f32 %v135_v48, %v46_v38  ;;  %v136_v54 = vsel %vm124_vm0, %v80_v36, %v109_v44  ;;  %v112_v55 = vrot.slane %v85_v45, 6  ;;  %v113_v56 = vrot.slane %v86_v46, 4  ;;  %v51_v36 = vld [vmem:[#allocation2 + $0x38] sm:$0xff] }
  0x19   :  { %v137_v57 = vsel %vm126_vm1, %v110_v49, %v111_v50  ;;  %v114_v58 = vrot.slane %v87_v51, 2  ;;  %v88_v59 = vperm.slane %v57_v47, 0  ;;  %v89_v60 = vperm.slane %v57_v47, 1 }
  0x1a   :  { %169 = vst [vmem:[#allocation7 + $0x10] sm:$0xff] %v161_v52  ;;  %v138_v62 = vsel %vm128_vm2, %v136_v54, %v137_v57  ;;  %v139_v0 = vsel %vm124_vm0, %v84_v42, %v112_v55  ;;  %v90_v1 = vperm.slane %v57_v47, 2  ;;  %v91_v2 = vperm.slane %v57_v47, 3 }
  0x1b   :  { %v162_v3 = vadd.f32 %v138_v62, %v47_v53  ;;  %v140_v4 = vsel %vm126_vm1, %v113_v56, %v114_v58  ;;  %v115_v5 = vrot.slane %v89_v60, 6  ;;  %v92_v6 = vperm.slane %v58_v61, 0 }
  0x1c   :  { %v141_v8 = vsel %vm128_vm2, %v139_v0, %v140_v4  ;;  %v116_v9 = vrot.slane %v90_v1, 4  ;;  %v117_v10 = vrot.slane %v91_v2, 2  ;;  %v93_v11 = vperm.slane %v58_v61, 1 }
  0x1d   :  { %170 = vst [vmem:[#allocation7 + $0x18] sm:$0xff] %v162_v3  ;;  %v163_v12 = vadd.f32 %v141_v8, %v48_v63  ;;  %v142_v14 = vsel %vm124_vm0, %v88_v59, %v115_v5  ;;  %v94_v15 = vperm.slane %v58_v61, 2  ;;  %v95_v16 = vperm.slane %v58_v61, 3 }
  0x1e   :  { %v143_v17 = vsel %vm126_vm1, %v116_v9, %v117_v10  ;;  %v118_v18 = vrot.slane %v93_v11, 6  ;;  %v96_v19 = vperm.slane %v59_v7, 0  ;;  %v97_v20 = vperm.slane %v59_v7, 1 }
  0x1f   :  { %171 = vst [vmem:[#allocation7 + $0x20] sm:$0xff] %v163_v12  ;;  %v144_v21 = vsel %vm128_vm2, %v142_v14, %v143_v17  ;;  %v119_v22 = vrot.slane %v94_v15, 4  ;;  %v120_v23 = vrot.slane %v95_v16, 2  ;;  %v98_v24 = vperm.slane %v59_v7, 2 }
  0x20   :  { %v164_v25 = vadd.f32 %v144_v21, %v49_v13  ;;  %v145_v27 = vsel %vm124_vm0, %v92_v6, %v118_v18  ;;  %v99_v28 = vperm.slane %v59_v7, 3  ;;  %v121_v29 = vrot.slane %v97_v20, 6 }
  0x21   :  { %v146_v30 = vsel %vm126_vm1, %v119_v22, %v120_v23  ;;  %v122_v31 = vrot.slane %v98_v24, 4 }
  0x22   :  { %172 = vst [vmem:[#allocation7 + $0x28] sm:$0xff] %v164_v25  ;;  %v147_v32 = vsel %vm128_vm2, %v145_v27, %v146_v30  ;;  %v123_v33 = vrot.slane %v99_v28, 2  ;;  %v148_v34 = vsel %vm124_vm0, %v96_v19, %v121_v29 }
  0x23   :  { %v165_v35 = vadd.f32 %v147_v32, %v50_v26 }
  0x24   :  { %v149_v37 = vsel %vm126_vm1, %v122_v31, %v123_v33 }
  0x25   :  { %173 = vst [vmem:[#allocation7 + $0x30] sm:$0xff] %v165_v35  ;;  %v150_v38 = vsel %vm128_vm2, %v148_v34, %v149_v37 }
  0x26   :  { %v166_v39 = vadd.f32 %v150_v38, %v51_v36 }
  0x28   :  { %174 = vst [vmem:[#allocation7 + $0x38] sm:$0xff] %v166_v39 }
  0x29   :  { %187 = dma.vmem_to_hbm [thread:$0]  %s180_s22, 1024, %s182_s25, [#allocation4], %s281_s17, %s281_s17, %s282_s18  }
  0x2a   :  { %278 = dma.done.wait [#allocation4], 1024  }
  0x2b   :  { %279 = vsyncadd [#allocation4], 4294966272 }
  0x2c   :  { %192 = vsyncpa [#allocation3], 1 }
  0x2d   :  { %193 = vsyncpa [#allocation6], 1 }
  0x2e   :  { %194 = vsyncpa [#allocation4], 1 }

</bundles_post_ra>
